<compile_context>
chip_gen: v7x
topology: tpu7x:2x2x1
jax: 0.10.0
libtpu: 0.0.40
codegen_flags: <defaults>
</compile_context>

<pallas_src>
import jax
import jax.numpy as jnp
from jax.experimental import pallas as pl
from jax.experimental.pallas import tpu as pltpu


def _actnorm_kernel(x_ref, s_ref, b_ref, y_ref):
    # x_ref: (nb, nc); s_ref / b_ref: (1, nc) lane-replicated per-channel
    # params (sublane broadcast only). Pure 2-op VALU stream per vreg.
    y_ref[...] = x_ref[...] * s_ref[...] + b_ref[...]


def _pick_tiles(n, chw, itemsize, target_bytes):
    """Pick (row_tile, col_tile) for an (n, chw) slab.

    * row tile: the full batch when n <= 8, otherwise a multiple of 8
      (sublane-dense), capped at 64 rows (column tiling does the rest);
    * col tile: the largest multiple-of-128 divisor of chw whose block stays
      under target_bytes; falls back to the full width when chw has no
      multiple-of-128 divisor (still legal: full-dim block);
    * if the resulting grid would have a single step, halve the column tile
      (when possible) so v7x's two TensorCores both get work.
    """
    nb = n if n <= 8 else min(64, (n // 8) * 8)

    if chw % 128 != 0:
        return nb, chw  # full-width block; always a legal BlockSpec

    budget = max(128, target_bytes // (nb * itemsize))
    nc = 128
    for cand in range(128, chw + 1, 128):
        if chw % cand == 0 and cand <= budget:
            nc = cand

    # Guarantee >= 2 total grid steps when possible (megacore on v7x,
    # HBM<->VMEM/compute pipelining everywhere).
    row_steps = (n + nb - 1) // nb
    if row_steps * (chw // nc) < 2:
        for cand in range(nc - 128, 127, -128):
            if chw % cand == 0:
                nc = cand
                break
    return nb, nc


def actnorm_forward(x, s, b, *, target_block_bytes=2 << 20):
    """x: (N, C, H, W); s, b: (1, C, 1, 1). Returns (y NCHW, logdet scalar)."""
    N, C, H, W = x.shape
    hw = H * W
    chw = C * hw

    # Lane-dense 2-D slab: rows = batch, cols = C*H*W.
    x2 = x.reshape(N, chw)

    # Lane-replicated per-channel params, broadcast once in the wrapper.
    s2 = jnp.broadcast_to(s.reshape(C, 1), (C, hw)).reshape(1, chw).astype(x.dtype)
    b2 = jnp.broadcast_to(b.reshape(C, 1), (C, hw)).reshape(1, chw).astype(x.dtype)

    itemsize = jnp.dtype(x.dtype).itemsize
    nb, nc = _pick_tiles(N, chw, itemsize, target_block_bytes)

    # Pad the batch axis so nb need not divide N (at most one extra row-block
    # of traffic, and only when actually required); sliced off below.
    n_pad = (-N) % nb
    if n_pad:
        x2 = jnp.pad(x2, ((0, n_pad), (0, 0)))
    n_rows = N + n_pad

    y2 = pl.pallas_call(
        _actnorm_kernel,
        out_shape=jax.ShapeDtypeStruct((n_rows, chw), x.dtype),
        grid=(n_rows // nb, chw // nc),
        in_specs=[
            pl.BlockSpec((nb, nc), lambda i, j: (i, j)),
            pl.BlockSpec((1, nc), lambda i, j: (0, j)),
            pl.BlockSpec((1, nc), lambda i, j: (0, j)),
        ],
        out_specs=pl.BlockSpec((nb, nc), lambda i, j: (i, j)),
        compiler_params=pltpu.CompilerParams(
            dimension_semantics=("parallel", "parallel"),
        ),
    )(x2, s2, b2)

    if n_pad:
        y2 = y2[:N]

    # logdet depends only on the C per-channel scales -> plain jnp in wrapper.
    logdet = jnp.float32(hw) * jnp.sum(jnp.log(jnp.abs(s.astype(jnp.float32))))

    return y2.reshape(N, C, H, W), logdet


def actnorm_initialize(x):
    """Data-dependent init (mirrors myActNorm.initialize; torch.std is unbiased)."""
    N, C, H, W = x.shape
    flat = jnp.transpose(x, (1, 0, 2, 3)).reshape(C, -1)
    mean = flat.mean(axis=1)
    std = flat.std(axis=1, ddof=1)
    s = (1.0 / (std + 1e-5)).reshape(1, C, 1, 1)
    b = (-mean).reshape(1, C, 1, 1)
    return s, b


if __name__ == "__main__":
    key = jax.random.PRNGKey(0)
    N, C, H, W = 2, 4, 16, 16
    x = jax.random.normal(key, (N, C, H, W), dtype=jnp.float32)

    # Deterministic parameter initialization (ActNorm data-dependent init).
    s, b = actnorm_initialize(x)

    y, logdet = actnorm_forward(x, s, b)
    y = jax.block_until_ready(y)
    logdet = jax.block_until_ready(logdet)

    # Reference check against plain-JAX forward (same semantics as the module).
    y_ref = s * x + b
    logdet_ref = (H * W) * jnp.sum(jnp.log(jnp.abs(s)))
    assert jnp.allclose(y, y_ref, rtol=1e-5, atol=1e-5)
    assert jnp.allclose(logdet, logdet_ref, rtol=1e-5, atol=1e-5)

    print("KERNEL_OK")
</pallas_src>

<mosaic_0001>
module attributes {stable_mosaic.version = 11 : i64} {
  func.func @_actnorm_kernel(%arg0: i32, %arg1: i32, %arg2: memref<2x512xf32, #tpu.memory_space<vmem>>, %arg3: memref<1x512xf32, #tpu.memory_space<vmem>>, %arg4: memref<1x512xf32, #tpu.memory_space<vmem>>, %arg5: memref<2x512xf32, #tpu.memory_space<vmem>>) attributes {dimension_semantics = [#tpu.dimension_semantics<parallel>, #tpu.dimension_semantics<parallel>], iteration_bounds = array<i64: 1, 2>, scalar_prefetch = 0 : i64, scratch_operands = 0 : i64, tpu.core_type = #tpu.core_type<tc>, window_params = [{transform_indices = @transform_0, window_bounds = array<i64: 2, 512>}, {transform_indices = @transform_1, window_bounds = array<i64: 1, 512>}, {transform_indices = @transform_2, window_bounds = array<i64: 1, 512>}, {transform_indices = @transform_3, window_bounds = array<i64: 2, 512>}]} {
    %c0 = arith.constant 0 : index
    %c0_0 = arith.constant 0 : index
    %0 = vector.load %arg2[%c0, %c0_0] : memref<2x512xf32, #tpu.memory_space<vmem>>, vector<2x512xf32>
    %c0_1 = arith.constant 0 : index
    %c0_2 = arith.constant 0 : index
    %1 = vector.load %arg3[%c0_1, %c0_2] : memref<1x512xf32, #tpu.memory_space<vmem>>, vector<1x512xf32>
    %2 = vector.broadcast %1 : vector<1x512xf32> to vector<2x512xf32>
    %3 = arith.mulf %0, %2 : vector<2x512xf32>
    %c0_3 = arith.constant 0 : index
    %c0_4 = arith.constant 0 : index
    %4 = vector.load %arg4[%c0_3, %c0_4] : memref<1x512xf32, #tpu.memory_space<vmem>>, vector<1x512xf32>
    %5 = vector.broadcast %4 : vector<1x512xf32> to vector<2x512xf32>
    %6 = arith.addf %3, %5 : vector<2x512xf32>
    %c0_5 = arith.constant 0 : index
    %c0_6 = arith.constant 0 : index
    %7 = vector.load %arg5[%c0_5, %c0_6] : memref<2x512xf32, #tpu.memory_space<vmem>>, vector<2x512xf32>
    tpu.vector_store %arg5[%c0_5, %c0_6], %6 {strides = array<i32>} : memref<2x512xf32, #tpu.memory_space<vmem>>, vector<2x512xf32>,
    return
  }
  func.func @transform_0(%arg0: i32, %arg1: i32) -> (i32, i32) {
    %c0_i32 = arith.constant 0 : i32
    return %arg0, %arg1 : i32, i32
  }
  func.func @transform_1(%arg0: i32, %arg1: i32) -> (i32, i32) {
    %c0_i32 = arith.constant 0 : i32
    %c0_i32_0 = arith.constant 0 : i32
    return %c0_i32, %arg1 : i32, i32
  }
  func.func @transform_2(%arg0: i32, %arg1: i32) -> (i32, i32) {
    %c0_i32 = arith.constant 0 : i32
    %c0_i32_0 = arith.constant 0 : i32
    return %c0_i32, %arg1 : i32, i32
  }
  func.func @transform_3(%arg0: i32, %arg1: i32) -> (i32, i32) {
    %c0_i32 = arith.constant 0 : i32
    return %arg0, %arg1 : i32, i32
  }
}

</mosaic_0001>

<bundles_post_ra>
// kernel: tpu_custom_call.1
= control target key start
LH: loop header
LB: loop body
LE: loop exit
PB: predicated region body
PF: predicated region fallthrough
CT: control target
= control target key end

     0   :  { %s1069_s0 = inlined_call_operand.hbm [shape: f32[2,1024], index: 0, kind: input, shape index: {}]   ;;  %s1070_s1 = inlined_call_operand.hbm [shape: f32[1,1024], index: 1, kind: input, shape index: {}]   ;;  %s1071_s2 = inlined_call_operand.hbm [shape: f32[1,1024], index: 2, kind: input, shape index: {}]   ;;  %s1072_s3 = inlined_call_operand.hbm [shape: f32[2,1024], index: 3, kind: output, shape index: {}]  }
   0x1   :  { %1078 = sst [smem:[#allocation15_spill]] %s1070_s1 }
   0x2   :  { %8 = vsyncpa [#allocation3], 0 }
   0x3   :  { %10 = vsyncpa [#allocation3 + $0x1], 0 }
   0x4   :  { %11 = vsyncpa [#allocation6], 0 }
   0x5   :  { %13 = vsyncpa [#allocation6 + $0x1], 0 }
   0x6   :  { %14 = vsyncpa [#allocation4], 0 }
   0x7   :  { %16 = vsyncpa [#allocation4 + $0x1], 0  ;;  %s805_s12 = smov 0   ;;  %s807_s13 = smov 0  }
   0x8   :  { %s809_s14 = smov 0   ;;  %s811_s15 = smov 0  }
   0x9   :  { %s813_s16 = smov 0   ;;  %s815_s17 = smov 0  }
   0xa LB: > { %1079 = sst [smem:[#allocation12_spill]] %s774_s16  ;;  %s836_s18 = sadd.s32 4294967295, %s778_s17   ;;  %s778_s17 = sphi %s815_s17, %s22_s17   ;;  %s774_s16 = sphi %s813_s16, %s1098_s16   ;;  %s770_s15 = sphi %s811_s15, %s1097_s15   ;;  %s766_s14 = sphi %s809_s14, %s1101_s14   ;;  %s762_s13 = sphi %s807_s13, %s1100_s13   ;;  %s758_s12 = sphi %s805_s12, %s1099_s12  }
   0xb   : > { %s503_s19 = sadd.s32 4294967294, %s778_s17   ;;  %s31_s20 = sadd.s32 1, %s774_s16 }
   0xc   : > { %s43_s21 = sadd.s32 1, %s766_s14  ;;  %p32_p0 = scmp.ge.s32.totalorder %s31_s20, 2 }
   0xd   : > { %p50_p1 = scmp.ne.s32.totalorder %s766_s14, %s762_s13  ;;  %p51_p2 = scmp.eq.s32.totalorder %s778_s17, 0 }
   0xe   : > { %p56_p3 = scmp.ne.s32.totalorder %s762_s13, %s758_s12  ;;  %s1103_s20 = smov (%p32_p0, %s31_s20), 0 }
   0xf   : > { %1080 = sst [smem:[#allocation13_spill]] %s1103_s20  ;;  %p848_p4 = por %p51_p2, %p50_p1 }
  0x10   : > { %p57_p5 = scmp.eq.s32.totalorder %s836_s18, 0  ;;  %s39_s23 = ssub.s32 %s774_s16, %s1103_s20 }
  0x11   : > { %p134_p6 = scmp.eq.s32.totalorder %s836_s18, 1  ;;  %p41_p7 = scmp.eq.s32.totalorder %s39_s23, 0 }
  0x12   : > { %p856_p8 = por %p57_p5, %p56_p3  ;;  %p140_p10 = scmp.eq.s32.totalorder %s503_s19, 1 }
  0x13   : > { %p860_p9 = por %p134_p6, %p50_p1  ;;  %p551_p13 = scmp.lt.s32.totalorder %s778_s17, 2 }
  0x14   : > { %s1082_s24 = scalar_select %p856_p8, 1, 0 }
  0x15   : > { %s1083_s25 = scalar_select %p860_p9, 1, 0 }
  0x16   : > { %s865_s26 = scalar_select %p41_p7, %s766_s14, %s43_s21  }
  0x17   : > { %p867_p11 = por %p140_p10, %p56_p3  ;;  %s874_s28 = sand.u32 1, %s766_s14  }
  0x18   : > { %1084 = sst [smem:[#allocation14_spill]] %s865_s26  ;;  %s181_s29 = sand.u32 1, %s778_s17  }
  0x19   : > { %s1085_s27 = scalar_select %p867_p11, 1, 0 }
  0x1a   : > { %s1073_s30 = sshll.u32 %s874_s28, 2  ;;  %p880_p0 = pnand %p551_p13, %p848_p4 }
  0x1b   : > { %s526_s5 = sshll.u32 %s774_s16, 6  ;;  %s1087_s1 = sld [smem:[#allocation15_spill]] }
  0x1c   : > { %s185_s9 = scalar_lea.vmem [#allocation5], %s1073_s30  ;;  %s897_s21 = scalar_lea.hbm %s1071_s2, %s526_s5 }
  0x1d   : > { %s193_s10 = sshll.u32 %s185_s9, 4  ;;  %s899_s22 = scalar_lea.sflag [#allocation6], %s181_s29  ;;  %s892_s10 = int_to_ptr.vmem [resolvable:$true] %s193_s10 }
  0x1e   : > { %p905_p2 = pneg %p880_p0 }
  0x21   : > { %s888_s8 = scalar_lea.hbm %s1087_s1, %s526_s5  ;;  %s607_s30 = scalar_lea.hbm %s1087_s1, 128 }
  0x22   : > { %s602_s23 = scalar_lea.hbm %s888_s8, 64  ;;  %p608_p5 = scmp.lt.u32.totalorder %s888_s8, %s1087_s1 }
  0x23   : > { %p603_p1 = scmp.ne.s32.totalorder %s888_s8, %s602_s23  ;;  %p609_p6 = scmp.lt.u32.totalorder %s607_s30, %s602_s23 }
  0x24   : > { %p611_p10 = scmp.lt.u32.totalorder %s602_s23, %s888_s8 }
  0x25   : > { %p605_p3 = pnand %p905_p2, %p603_p1  ;;  %p610_p7 = por %p609_p6, %p608_p5 }
  0x27   : > { %p606_p4 = pneg %p605_p3  ;;  %p612_p13 = por %p611_p10, %p610_p7 }
  0x29   : > { %p613_p12 = pnand %p612_p13, %p606_p4 }
  0x2b   : > { %616 = shalt.err (!%p613_p12)
}
  0x2c   : > { %s617_s29 = scalar_lea.vmem %s892_s10, 64  ;;  %s780_s19 = smov [#allocation5]  }
  0x2d   : > { %p618_p1 = scmp.ne.s32.totalorder %s892_s10, %s617_s29  ;;  %s622_s7 = sshll.u32 %s780_s19, 4  ;;  %s623_s7 = int_to_ptr.vmem [resolvable:$false] %s622_s7 }
  0x2e   : > { %s624_s9 = scalar_lea.vmem %s623_s7, 128  ;;  %p625_p9 = scmp.lt.s32.totalorder %s892_s10, %s623_s7 }
  0x2f   : > { %p620_p3 = pnand %p618_p1, %p905_p2  ;;  %p626_p8 = scmp.lt.s32.totalorder %s624_s9, %s617_s29 }
  0x31   : > { %p621_p11 = pneg %p620_p3  ;;  %p627_p5 = por %p626_p8, %p625_p9 }
  0x33   : > { %p628_p6 = pnand %p627_p5, %p621_p11 }
  0x35   : > { %631 = shalt.err (!%p628_p6)
}
  0x36   : > { %543 = dma.hbm_to_vmem [thread:$0]  (!%p880_p0), %s888_s8, 64, %s892_s10, %s899_s22  }
  0x37   : > { %p515_p12 = scmp.ge.s32.totalorder %s778_s17, 1  ;;  %p217_p4 = scmp.lt.s32.totalorder %s778_s17, 3 }
  0x38   : > { %s506_s23 = sshll.u32 %s874_s28, 3  ;;  %s525_s11 = sshll.u32 %s774_s16, 7 }
  0x39   : > { %p931_p7 = pnand %p515_p12, %p217_p4  ;;  %s940_s19 = scalar_lea.hbm %s1069_s0, %s525_s11 }
  0x3a   : > { %s164_s7 = scalar_lea.vmem [#allocation2], %s506_s23  ;;  %s1090_s10 = sshll.u32 %s874_s28, 2 }
  0x3b   : > { %s1089_s30 = scalar_select %p931_p7, 1, 0 }
  0x3c   : > { %s174_s8 = sshll.u32 %s164_s7, 4  ;;  %s204_s9 = scalar_lea.vmem [#allocation7], %s1090_s10  ;;  %s944_s8 = int_to_ptr.vmem [resolvable:$true] %s174_s8 }
  0x3d   : > { %s212_s1 = sshll.u32 %s204_s9, 4  ;;  %s161_s20 = scalar_lea.sflag [#allocation3], %s874_s28  ;;  %s946_s1 = int_to_ptr.vmem [resolvable:$true] %s212_s1 }
  0x3e   : > { %s632_s16 = scalar_lea.hbm %s940_s19, 128  ;;  %s637_s29 = scalar_lea.hbm %s1069_s0, 256 }
  0x3f   : > { %p633_p8 = scmp.ne.s32.totalorder %s940_s19, %s632_s16  ;;  %p638_p10 = scmp.lt.u32.totalorder %s940_s19, %s1069_s0 }
  0x40   : > { %p639_p13 = scmp.lt.u32.totalorder %s637_s29, %s632_s16  ;;  %p641_p3 = scmp.lt.u32.totalorder %s632_s16, %s940_s19 }
  0x41   : > { %p635_p9 = pnand %p633_p8, %p905_p2 }
  0x42   : > { %p640_p1 = por %p639_p13, %p638_p10 }
  0x43   : > { %p636_p11 = pneg %p635_p9 }
  0x44   : > { %p642_p5 = por %p641_p3, %p640_p1 }
  0x46   : > { %p643_p6 = pnand %p642_p5, %p636_p11 }
  0x48   : > { %646 = shalt.err (!%p643_p6)
}
  0x49   : > { %s647_s28 = scalar_lea.vmem %s944_s8, 128  ;;  %s781_s7 = smov [#allocation2]  }
  0x4a   : > { %p648_p12 = scmp.ne.s32.totalorder %s944_s8, %s647_s28  ;;  %s652_s10 = sshll.u32 %s781_s7, 4  ;;  %s653_s10 = int_to_ptr.vmem [resolvable:$false] %s652_s10 }
  0x4b   : > { %s654_s26 = scalar_lea.vmem %s653_s10, 256  ;;  %p655_p9 = scmp.lt.s32.totalorder %s944_s8, %s653_s10 }
  0x4c   : > { %p650_p4 = pnand %p648_p12, %p905_p2  ;;  %p656_p7 = scmp.lt.s32.totalorder %s654_s26, %s647_s28 }
  0x4e   : > { %p651_p8 = pneg %p650_p4  ;;  %p657_p10 = por %p656_p7, %p655_p9 }
  0x50   : > { %p658_p13 = pnand %p657_p10, %p651_p8 }
  0x52   : > { %661 = shalt.err (!%p658_p13)
}
  0x53   : > { %540 = dma.hbm_to_vmem [thread:$0]  (!%p880_p0), %s940_s19, 128, %s944_s8, %s161_s20  }
  0x54   : > { %s662_s16 = scalar_lea.hbm %s897_s21, 64  ;;  %s667_s5 = scalar_lea.hbm %s1071_s2, 128 }
  0x55   : > { %p663_p11 = scmp.ne.s32.totalorder %s897_s21, %s662_s16  ;;  %p668_p7 = scmp.lt.u32.totalorder %s897_s21, %s1071_s2 }
  0x56   : > { %p669_p5 = scmp.lt.u32.totalorder %s667_s5, %s662_s16  ;;  %p671_p12 = scmp.lt.u32.totalorder %s662_s16, %s897_s21 }
  0x57   : > { %p665_p1 = pnand %p663_p11, %p905_p2 }
  0x58   : > { %p670_p6 = por %p669_p5, %p668_p7 }
  0x59   : > { %p666_p3 = pneg %p665_p1 }
  0x5a   : > { %p672_p4 = por %p671_p12, %p670_p6 }
  0x5c   : > { %p673_p8 = pnand %p672_p4, %p666_p3 }
  0x5e   : > { %676 = shalt.err (!%p673_p8)
}
  0x5f   : > { %s677_s20 = scalar_lea.vmem %s946_s1, 64  ;;  %s782_s19 = smov [#allocation7]  }
  0x60   : > { %p678_p9 = scmp.ne.s32.totalorder %s946_s1, %s677_s20  ;;  %s682_s8 = sshll.u32 %s782_s19, 4  ;;  %s683_s8 = int_to_ptr.vmem [resolvable:$false] %s682_s8 }
  0x61   : > { %s684_s28 = scalar_lea.vmem %s683_s8, 128  ;;  %p685_p11 = scmp.lt.s32.totalorder %s946_s1, %s683_s8 }
  0x62   : > { %p680_p10 = pnand %p678_p9, %p905_p2  ;;  %p686_p1 = scmp.lt.s32.totalorder %s684_s28, %s677_s20 }
  0x64   : > { %p681_p13 = pneg %p680_p10  ;;  %p687_p7 = por %p686_p1, %p685_p11 }
  0x66   : > { %p688_p5 = pnand %p687_p7, %p681_p13 }
  0x68   : > { %691 = shalt.err (!%p688_p5)
}
  0x69   : > { %546 = dma.hbm_to_vmem [thread:$0]  (!%p880_p0), %s897_s21, 64, %s946_s1, %s899_s22  }
  0x6a   : > { %p1091_p3 = scmp.ne.s32.totalorder %s1089_s30, 0 }
  0x6b   : > { %s995_s6 = sand.u32 (!%p1091_p3), 1, %s762_s13   ;;  %p1092_p2 = scmp.ne.s32.totalorder (!%p1091_p3), %s1082_s24, 0 }
  0x6c   : > { %221 = sbr.rel (%p1091_p3) target bundleno = 151 (0x97), region = 32  ;;  %s516_s7 = sshll.u32 (!%p1091_p3), %s995_s6, 3 }
  0x6d   : > { %s224_s10 = scalar_lea.sflag (!%p1091_p3), [#allocation3], %s995_s6  ;;  %s1001_s26 = scalar_lea.vmem (!%p1091_p3), [#allocation2], %s516_s7 }
  0x73   : > { %745 = dma.done.wait (%p1092_p2), %s224_s10, 128  }
  0x74   : > { %747 = vsyncadd (%p1092_p2), %s224_s10, 4294967168  ;;  %s232_s1 = sand.u32 1, %s836_s18   ;;  %s517_s4 = sshll.u32 %s995_s6, 2 }
  0x75   : > { %s233_s21 = scalar_lea.sflag [#allocation6], %s232_s1  ;;  %s236_s22 = scalar_lea.vmem [#allocation5], %s517_s4 }
  0x76   : > { %749 = dma.done.wait (%p1092_p2), %s233_s21, 128  }
  0x77   : > { %751 = vsyncadd (%p1092_p2), %s233_s21, 4294967168  ;;  %v285_v0 = vlaneseq  ;;  %v783_v1 = vmov 1983009808   ;;  %v283_v9 = vld [vmem:[%s236_s22] sm:$0xf]  ;;  %s245_s18 = scalar_lea.vmem [#allocation7], %s517_s4 }
  0x78   : > { %v304_v2 = vunpack.c.l.s4 %v783_v1  ;;  %v320_v11 = vld [vmem:[%s245_s18] sm:$0xf]  ;;  %v282_v26 = vld [vmem:[%s1001_s26] sm:$0xff]  ;;  %s277_s24 = scalar_lea.vmem [#allocation8], %s516_s7  ;;  %s528_s16 = sshll.u32 %s770_s15, 7 }
  0x79   : > { %v286_v3 = vshrl.u32 %v285_v0, 7  ;;  %s375_s30 = sshll.u32 %s277_s24, 4  ;;  %s1022_s5 = scalar_lea.hbm %s1072_s3, %s528_s16  ;;  %s1017_s30 = int_to_ptr.vmem [resolvable:$true] %s375_s30 }
  0x7a   : > { %v305_v4 = vunpack.c.0.s8 %v304_v2  ;;  %s359_s29 = scalar_lea.sflag [#allocation4], %s995_s6  ;;  %s692_s23 = scalar_lea.vmem %s1017_s30, 128 }
  0x7b   : > { %v287_v5 = vsub.s32 0, %v286_v3  ;;  %v291_v6 = vsub.s32 1, %v286_v3  ;;  %v295_v7 = vsub.s32 2, %v286_v3  ;;  %v299_v8 = vsub.s32 3, %v286_v3  ;;  %p693_p0 = scmp.ne.s32.totalorder %s1017_s30, %s692_s23  ;;  %p1093_p6 = scmp.ne.s32.totalorder %s1083_s25, 0 }
  0x7c   : > { %v308_v10 = vsub.s32 %v305_v4, %v286_v3  ;;  %s784_s15 = smov [#allocation8]  }
  0x7d   : > { %v288_v12 = vrot.slane %v283_v9, %v287_v5  ;;  %v292_v13 = vrot.slane %v283_v9, %v291_v6  ;;  %v296_v14 = vrot.slane %v283_v9, %v295_v7  ;;  %v300_v15 = vrot.slane %v283_v9, %v299_v8  ;;  %p694_p12 = pnand %p693_p0, %p1093_p6  ;;  %s696_s20 = sshll.u32 %s784_s15, 4  ;;  %s697_s20 = int_to_ptr.vmem [resolvable:$false] %s696_s20 }
  0x7e   : > { %v325_v16 = vrot.slane %v320_v11, %v287_v5  ;;  %v329_v17 = vrot.slane %v320_v11, %v291_v6  ;;  %v333_v18 = vrot.slane %v320_v11, %v295_v7  ;;  %v337_v19 = vrot.slane %v320_v11, %v299_v8  ;;  %s698_s19 = scalar_lea.vmem %s697_s20, 256  ;;  %p699_p8 = scmp.lt.s32.totalorder %s1017_s30, %s697_s20 }
  0x7f   : > { %v301_v20 = vcombine.low %v288_v12, %v292_v13  ;;  %v302_v21 = vcombine.low %v296_v14, %v300_v15  ;;  %p695_p4 = pneg %p694_p12  ;;  %p700_p9 = scmp.lt.s32.totalorder %s698_s19, %s692_s23 }
  0x80   : > { %v338_v22 = vcombine.low %v325_v16, %v329_v17  ;;  %v339_v23 = vcombine.low %v333_v18, %v337_v19 }
  0x81   : > { %v309_v24 = vrot.slane %v301_v20, %v308_v10  ;;  %v316_v25 = vrot.slane %v302_v21, %v308_v10  ;;  %p701_p10 = por %p700_p9, %p699_p8 }
  0x82   : > { %v346_v27 = vrot.slane %v338_v22, %v308_v10  ;;  %v353_v28 = vrot.slane %v339_v23, %v308_v10 }
  0x83   : > { %v317_v29 = vcombine.low %v309_v24, %v316_v25  ;;  %p702_p13 = pnand %p701_p10, %p695_p4 }
  0x84   : > { %v354_v30 = vcombine.low %v346_v27, %v353_v28 }
  0x85   : > { %v319_v31 = vmul.f32 %v317_v29, %v282_v26 }
  0x87   : > { %v356_v32 = vadd.f32 %v354_v30, %v319_v31 }
  0x89   : > { %357 = vst [vmem:[%s277_s24] sm:$0xff] %v356_v32 }
  0x8a   : > { %705 = shalt.err (!%p702_p13)
}
  0x8b   : > { %s706_s8 = scalar_lea.hbm %s1022_s5, 128  ;;  %s710_s7 = scalar_lea.hbm %s1072_s3, 256 }
  0x8c   : > { %p707_p11 = scmp.ne.s32.totalorder %s1022_s5, %s706_s8  ;;  %p711_p5 = scmp.lt.u32.totalorder %s1022_s5, %s1072_s3 }
  0x8d   : > { %p712_p3 = scmp.lt.u32.totalorder %s710_s7, %s706_s8  ;;  %p714_p0 = scmp.lt.u32.totalorder %s706_s8, %s1022_s5 }
  0x8e   : > { %p708_p1 = pnand %p707_p11, %p1093_p6 }
  0x8f   : > { %p713_p2 = por %p712_p3, %p711_p5 }
  0x90   : > { %p709_p7 = pneg %p708_p1 }
  0x91   : > { %p715_p12 = por %p714_p0, %p713_p2 }
  0x93   : > { %p716_p4 = pnand %p715_p12, %p709_p7 }
  0x95   : > { %719 = shalt.err (!%p716_p4)
}
  0x96   : > { %535 = dma.vmem_to_hbm [thread:$0]  (%p1093_p6), %s1017_s30, 128, %s1022_s5, %s359_s29  }
  0x97 PF: > { %s387_s1 = sand.u32 1, %s758_s12   ;;  %p1094_p8 = scmp.ne.s32.totalorder %s1085_s27, 0 }
  0x98   : > { %p1095_p9 = scmp.ge.s32.totalorder %s778_s17, 2  ;;  %s388_s4 = scalar_lea.sflag [#allocation4], %s387_s1 }
  0x9a   : > { %p548_p10 = pnand %p1095_p9, %p1094_p8 }
  0x9c   : > { %753 = dma.done.wait (!%p548_p10), %s388_s4, 128  }
  0x9d   : > { %755 = vsyncadd (!%p548_p10), %s388_s4, 4294967168  ;;  %s22_s17 = sadd.s32 1, %s778_s17   ;;  %s1096_s25 = sld [smem:[#allocation14_spill]] }
  0x9e   : > { %p19_p13 = scmp.ge.s32.totalorder %s22_s17, 4   ;;  %s1097_s15 = sld [smem:[#allocation12_spill]] }
  0x9f   : > { %s1098_s16 = sld [smem:[#allocation13_spill]]  ;;  %s1099_s12 = smov %s762_s13 }
  0xa0   : > { %s1100_s13 = smov %s766_s14  ;;  %21 = sbr.rel (!%p19_p13) target bundleno = 10 (0xa), region = 101 }
  0xa3   : > { %s1101_s14 = smov %s1096_s25 }
  0xa7   :  { %393 = vsyncpa [#allocation3], 1 }
  0xa8   :  { %395 = vsyncpa [#allocation3 + $0x1], 1 }
  0xa9   :  { %396 = vsyncpa [#allocation6], 1 }
  0xaa   :  { %398 = vsyncpa [#allocation6 + $0x1], 1 }
  0xab   :  { %399 = vsyncpa [#allocation4], 1 }
  0xac   :  { %401 = vsyncpa [#allocation4 + $0x1], 1 }

</bundles_post_ra>
